<compile_context>
chip_gen: v7x
topology: tpu7x:2x2x1
jax: 0.10.0
libtpu: 0.0.40
codegen_flags: <defaults>
</compile_context>

<pallas_src>
import jax
import jax.numpy as jnp
from jax.experimental import pallas as pl
from jax.experimental.pallas import tpu as pltpu

LANE = 128              # lane width: hidden feature dims padded to multiples of this
SUBLANE = 8             # f32 sublane tile: batch tiles are multiples of this
OUT_FEATURES = 14 * 25  # 350


def _round_up(x, m):
    return (x + m - 1) // m * m


# --------------------------------------------------------------------------------------
# Fused kernel: whole MLP in one body; weights resident in VMEM, activations never leave
# vregs/VMEM between layers.
# --------------------------------------------------------------------------------------
def _make_fused_decoder_kernel(num_layers):
    def kernel(x_ref, *refs):
        # refs = (w0, b0, w1, b1, ..., w{L-1}, b{L-1}, o_ref)
        o_ref = refs[-1]
        z = x_ref[...].astype(jnp.float32)               # (tile_b, K0) raw input width
        for i in range(num_layers):                      # static unroll, traced once
            w = refs[2 * i][...]                         # (K_i, N_i)  compute dtype
            b = refs[2 * i + 1][...]                     # (1,   N_i)  f32
            y = jnp.dot(z.astype(w.dtype), w,
                        preferred_element_type=jnp.float32)   # MXU, f32 accumulation
            y = y + b                                    # f32 epilogue (VPU)
            z = jnp.maximum(y, 0.0) if i < num_layers - 1 else y
        o_ref[...] = z.astype(o_ref.dtype)
    return kernel


# --------------------------------------------------------------------------------------
# Parameter preparation.
#   * Layer 0 keeps its true K width (matches the raw input block read from HBM).
#   * The last layer keeps its true N width (kernel stores straight into (batch, 350)).
#   * All other (hidden) K/N dims are zero-padded to 128 lanes (exact for Linear+ReLU).
#   * Weights stored in compute_dtype (bf16 default); biases stay f32.
# --------------------------------------------------------------------------------------
def prepare_mt_decoder_params(params, compute_dtype=jnp.bfloat16):
    prepared = []
    n_layers = len(params)
    for idx, (w, b) in enumerate(params):
        din, dout = w.shape
        kp = din if idx == 0 else _round_up(din, LANE)
        np_ = dout if idx == n_layers - 1 else _round_up(dout, LANE)
        w_p = jnp.zeros((kp, np_), jnp.float32).at[:din, :dout].set(w).astype(compute_dtype)
        b_p = jnp.zeros((1, np_), jnp.float32).at[:, :dout].set(b)
        prepared.append((w_p, b_p))
    return prepared


def _choose_tile_b(batch, tile_b):
    """Pick the batch tile: big (amortize grid overhead), single exact tile for tiny
    batches, and >= 2 tiles for larger batches so v7x's two TensorCores both get work."""
    tile_b = int(tile_b)
    if batch >= 2 * SUBLANE:
        tile_b = min(tile_b, _round_up((batch + 1) // 2, SUBLANE))
    if tile_b >= batch:
        return batch                              # one block == full array dim (always legal)
    return max(SUBLANE, _round_up(tile_b, SUBLANE))  # multiple of 8; tail block is masked


# --------------------------------------------------------------------------------------
# Forward pass: one pallas_call for the whole decoder, grid over batch tiles.
# --------------------------------------------------------------------------------------
def mt_decoder_forward(z, prepared_params, *, tile_b=2048, out_dtype=None):
    """Pallas implementation of MtDecoder.forward.

    z:               (batch, bottleneck) float32 (or bf16)
    prepared_params: output of prepare_mt_decoder_params
    out_dtype:       HBM output dtype (default: z.dtype; pass jnp.bfloat16 to halve
                     output HBM traffic if the consumer tolerates it).
    """
    batch, d_in = z.shape
    num_layers = len(prepared_params)
    assert prepared_params[0][0].shape[0] == d_in, "first-layer K must match input width"
    n_out = prepared_params[-1][0].shape[1]
    out_dtype = z.dtype if out_dtype is None else out_dtype

    tile_b = _choose_tile_b(batch, tile_b)
    num_tiles = pl.cdiv(batch, tile_b)

    vmem = pltpu.MemorySpace.VMEM
    # Input: raw (unpadded) width; last block dim equals the full array dim so the
    # (8,128) layout rule is satisfied without any HBM-side padding.
    in_specs = [pl.BlockSpec((tile_b, d_in), lambda i: (i, 0), memory_space=vmem)]
    operands = [z]
    for (w_p, b_p) in prepared_params:
        # Weights/biases: one full-array block with a constant index map -> DMA'd once,
        # resident in VMEM for every batch tile and every layer.
        in_specs.append(pl.BlockSpec(w_p.shape, lambda i: (0, 0), memory_space=vmem))
        in_specs.append(pl.BlockSpec(b_p.shape, lambda i: (0, 0), memory_space=vmem))
        operands.extend([w_p, b_p])

    kernel = _make_fused_decoder_kernel(num_layers)

    return pl.pallas_call(
        kernel,
        out_shape=jax.ShapeDtypeStruct((batch, n_out), out_dtype),
        grid=(num_tiles,),
        in_specs=in_specs,
        out_specs=pl.BlockSpec((tile_b, n_out), lambda i: (i, 0), memory_space=vmem),
        compiler_params=pltpu.CompilerParams(
            dimension_semantics=("parallel",),      # batch tiles independent (megacore / 2-TC)
            vmem_limit_bytes=32 * 1024 * 1024,      # headroom for tile_b=2048 on v5e
        ),
    )(*operands)


# --------------------------------------------------------------------------------------
# Parameter init matching torch.nn.Linear defaults (shapes from MtDecoder.__init__).
# --------------------------------------------------------------------------------------
def init_mt_decoder_params(key, bottleneck, hidden_dim, num_layer):
    if num_layer <= 1:
        dims = [(bottleneck, OUT_FEATURES)]
    else:
        dims = [(bottleneck, hidden_dim)]
        for _ in range(num_layer - 2):
            dims.append((hidden_dim, hidden_dim))
        dims.append((hidden_dim, OUT_FEATURES))

    params = []
    for (din, dout) in dims:
        key, kw, kb = jax.random.split(key, 3)
        bound = 1.0 / jnp.sqrt(jnp.float32(din))   # torch default: U(-1/sqrt(fan_in), ...)
        w = jax.random.uniform(kw, (din, dout), jnp.float32, -bound, bound)
        b = jax.random.uniform(kb, (1, dout), jnp.float32, -bound, bound)
        params.append((w, b))
    return params


def mt_decoder_reference(z, params):
    """Plain-JAX reference (unpadded, f32) for correctness checking."""
    for (w, b) in params[:-1]:
        z = jnp.maximum(z @ w + b, 0.0)
    w, b = params[-1]
    return z @ w + b


if __name__ == "__main__":
    # Small, forward-consistent shapes: batch=8, bottleneck=32, hidden_dim=64, num_layer=3.
    batch = 8
    bottleneck = 32
    hidden_dim = 64
    num_layer = 3

    key = jax.random.PRNGKey(0)
    key, kz, kz2 = jax.random.split(key, 3)
    z = jax.random.normal(kz, (batch, bottleneck), jnp.float32)
    params = init_mt_decoder_params(key, bottleneck, hidden_dim, num_layer)
    ref = mt_decoder_reference(z, params)

    # --- default path: bf16 MXU operands, f32 accumulate + f32 epilogue -----------------
    pp_bf16 = prepare_mt_decoder_params(params)                    # bf16 default
    out_bf16 = jax.block_until_ready(mt_decoder_forward(z, pp_bf16))
    assert out_bf16.shape == (batch, OUT_FEATURES), out_bf16.shape
    assert jnp.allclose(out_bf16, ref, atol=5e-2, rtol=5e-2), "bf16 fused kernel mismatch"

    # --- exact f32 path ------------------------------------------------------------------
    pp_f32 = prepare_mt_decoder_params(params, jnp.float32)
    out_f32 = jax.block_until_ready(mt_decoder_forward(z, pp_f32))
    assert out_f32.shape == (batch, OUT_FEATURES), out_f32.shape
    assert jnp.allclose(out_f32, ref, atol=1e-4, rtol=1e-4), "f32 fused kernel mismatch"

    # --- uneven batch: exercises the cdiv grid, >=2 tiles, and the masked tail tile ------
    batch2 = 20
    z2 = jax.random.normal(kz2, (batch2, bottleneck), jnp.float32)
    ref2 = mt_decoder_reference(z2, params)
    out2 = jax.block_until_ready(mt_decoder_forward(z2, pp_bf16))  # tile_b -> 16, grid = 2
    assert out2.shape == (batch2, OUT_FEATURES), out2.shape
    assert jnp.allclose(out2, ref2, atol=5e-2, rtol=5e-2), "uneven-batch kernel mismatch"

    print("KERNEL_OK")
</pallas_src>

<mosaic_0001>
module attributes {stable_mosaic.version = 11 : i64} {
  func.func @kernel(%arg0: i32, %arg1: memref<8x32xf32, #tpu.memory_space<vmem>>, %arg2: memref<32x128xbf16, #tpu.memory_space<vmem>>, %arg3: memref<1x128xf32, #tpu.memory_space<vmem>>, %arg4: memref<128x128xbf16, #tpu.memory_space<vmem>>, %arg5: memref<1x128xf32, #tpu.memory_space<vmem>>, %arg6: memref<128x350xbf16, #tpu.memory_space<vmem>>, %arg7: memref<1x350xf32, #tpu.memory_space<vmem>>, %arg8: memref<8x350xf32, #tpu.memory_space<vmem>>) attributes {dimension_semantics = [#tpu.dimension_semantics<parallel>], iteration_bounds = array<i64: 1>, scalar_prefetch = 0 : i64, scratch_operands = 0 : i64, tpu.core_type = #tpu.core_type<tc>, window_params = [{transform_indices = @transform_0, window_bounds = array<i64: 8, 32>}, {pipeline_mode = #tpu.pipeline_mode<synchronous>, transform_indices = @transform_1, window_bounds = array<i64: 32, 128>}, {pipeline_mode = #tpu.pipeline_mode<synchronous>, transform_indices = @transform_2, window_bounds = array<i64: 1, 128>}, {pipeline_mode = #tpu.pipeline_mode<synchronous>, transform_indices = @transform_3, window_bounds = array<i64: 128, 128>}, {pipeline_mode = #tpu.pipeline_mode<synchronous>, transform_indices = @transform_4, window_bounds = array<i64: 1, 128>}, {pipeline_mode = #tpu.pipeline_mode<synchronous>, transform_indices = @transform_5, window_bounds = array<i64: 128, 350>}, {pipeline_mode = #tpu.pipeline_mode<synchronous>, transform_indices = @transform_6, window_bounds = array<i64: 1, 350>}, {transform_indices = @transform_7, window_bounds = array<i64: 8, 350>}]} {
    %c0 = arith.constant 0 : index
    %c0_0 = arith.constant 0 : index
    %0 = vector.load %arg1[%c0, %c0_0] : memref<8x32xf32, #tpu.memory_space<vmem>>, vector<8x32xf32>
    %c0_1 = arith.constant 0 : index
    %c0_2 = arith.constant 0 : index
    %1 = vector.load %arg2[%c0_1, %c0_2] : memref<32x128xbf16, #tpu.memory_space<vmem>>, vector<32x128xbf16>
    %c0_3 = arith.constant 0 : index
    %c0_4 = arith.constant 0 : index
    %2 = vector.load %arg3[%c0_3, %c0_4] : memref<1x128xf32, #tpu.memory_space<vmem>>, vector<1x128xf32>
    %3 = arith.truncf %0 : vector<8x32xf32> to vector<8x32xbf16>
    %cst = arith.constant dense<0.000000e+00> : vector<8x128xf32>
    %4 = tpu.matmul %3, %1, %cst {dimension_numbers = #tpu.dot_dimension_numbers<[1], [0], [0], [1], [0, 0, 1, 1], [], []>} : vector<8x32xbf16>, vector<32x128xbf16>, vector<8x128xf32> -> vector<8x128xf32>
    %5 = vector.broadcast %2 : vector<1x128xf32> to vector<8x128xf32>
    %6 = arith.addf %4, %5 : vector<8x128xf32>
    %cst_5 = arith.constant 0.000000e+00 : f32
    %7 = vector.broadcast %cst_5 : f32 to vector<8x128xf32>
    %8 = arith.maximumf %6, %7 : vector<8x128xf32>
    %c0_6 = arith.constant 0 : index
    %c0_7 = arith.constant 0 : index
    %9 = vector.load %arg4[%c0_6, %c0_7] : memref<128x128xbf16, #tpu.memory_space<vmem>>, vector<128x128xbf16>
    %c0_8 = arith.constant 0 : index
    %c0_9 = arith.constant 0 : index
    %10 = vector.load %arg5[%c0_8, %c0_9] : memref<1x128xf32, #tpu.memory_space<vmem>>, vector<1x128xf32>
    %11 = arith.truncf %8 : vector<8x128xf32> to vector<8x128xbf16>
    %cst_10 = arith.constant dense<0.000000e+00> : vector<8x128xf32>
    %12 = tpu.matmul %11, %9, %cst_10 {dimension_numbers = #tpu.dot_dimension_numbers<[1], [0], [0], [1], [0, 0, 1, 1], [], []>} : vector<8x128xbf16>, vector<128x128xbf16>, vector<8x128xf32> -> vector<8x128xf32>
    %13 = vector.broadcast %10 : vector<1x128xf32> to vector<8x128xf32>
    %14 = arith.addf %12, %13 : vector<8x128xf32>
    %cst_11 = arith.constant 0.000000e+00 : f32
    %15 = vector.broadcast %cst_11 : f32 to vector<8x128xf32>
    %16 = arith.maximumf %14, %15 : vector<8x128xf32>
    %c0_12 = arith.constant 0 : index
    %c0_13 = arith.constant 0 : index
    %17 = vector.load %arg6[%c0_12, %c0_13] : memref<128x350xbf16, #tpu.memory_space<vmem>>, vector<128x350xbf16>
    %c0_14 = arith.constant 0 : index
    %c0_15 = arith.constant 0 : index
    %18 = vector.load %arg7[%c0_14, %c0_15] : memref<1x350xf32, #tpu.memory_space<vmem>>, vector<1x350xf32>
    %19 = arith.truncf %16 : vector<8x128xf32> to vector<8x128xbf16>
    %cst_16 = arith.constant dense<0.000000e+00> : vector<8x350xf32>
    %20 = tpu.matmul %19, %17, %cst_16 {dimension_numbers = #tpu.dot_dimension_numbers<[1], [0], [0], [1], [0, 0, 1, 1], [], []>} : vector<8x128xbf16>, vector<128x350xbf16>, vector<8x350xf32> -> vector<8x350xf32>
    %21 = vector.broadcast %18 : vector<1x350xf32> to vector<8x350xf32>
    %22 = arith.addf %20, %21 : vector<8x350xf32>
    %c0_17 = arith.constant 0 : index
    %c0_18 = arith.constant 0 : index
    %23 = vector.load %arg8[%c0_17, %c0_18] : memref<8x350xf32, #tpu.memory_space<vmem>>, vector<8x350xf32>
    tpu.vector_store %arg8[%c0_17, %c0_18], %22 {strides = array<i32>} : memref<8x350xf32, #tpu.memory_space<vmem>>, vector<8x350xf32>,
    return
  }
  func.func @transform_0(%arg0: i32) -> (i32, i32) {
    %c0_i32 = arith.constant 0 : i32
    %c0_i32_0 = arith.constant 0 : i32
    return %arg0, %c0_i32 : i32, i32
  }
  func.func @transform_1(%arg0: i32) -> (i32, i32) {
    %c0_i32 = arith.constant 0 : i32
    %c0_i32_0 = arith.constant 0 : i32
    %c0_i32_1 = arith.constant 0 : i32
    return %c0_i32, %c0_i32_0 : i32, i32
  }
  func.func @transform_2(%arg0: i32) -> (i32, i32) {
    %c0_i32 = arith.constant 0 : i32
    %c0_i32_0 = arith.constant 0 : i32
    %c0_i32_1 = arith.constant 0 : i32
    return %c0_i32, %c0_i32_0 : i32, i32
  }
  func.func @transform_3(%arg0: i32) -> (i32, i32) {
    %c0_i32 = arith.constant 0 : i32
    %c0_i32_0 = arith.constant 0 : i32
    %c0_i32_1 = arith.constant 0 : i32
    return %c0_i32, %c0_i32_0 : i32, i32
  }
  func.func @transform_4(%arg0: i32) -> (i32, i32) {
    %c0_i32 = arith.constant 0 : i32
    %c0_i32_0 = arith.constant 0 : i32
    %c0_i32_1 = arith.constant 0 : i32
    return %c0_i32, %c0_i32_0 : i32, i32
  }
  func.func @transform_5(%arg0: i32) -> (i32, i32) {
    %c0_i32 = arith.constant 0 : i32
    %c0_i32_0 = arith.constant 0 : i32
    %c0_i32_1 = arith.constant 0 : i32
    return %c0_i32, %c0_i32_0 : i32, i32
  }
  func.func @transform_6(%arg0: i32) -> (i32, i32) {
    %c0_i32 = arith.constant 0 : i32
    %c0_i32_0 = arith.constant 0 : i32
    %c0_i32_1 = arith.constant 0 : i32
    return %c0_i32, %c0_i32_0 : i32, i32
  }
  func.func @transform_7(%arg0: i32) -> (i32, i32) {
    %c0_i32 = arith.constant 0 : i32
    %c0_i32_0 = arith.constant 0 : i32
    return %arg0, %c0_i32 : i32, i32
  }
}

</mosaic_0001>

<bundles_post_ra>
// kernel: tpu_custom_call.1
= control target key start
LH: loop header
LB: loop body
LE: loop exit
PB: predicated region body
PF: predicated region fallthrough
CT: control target
= control target key end

     0   :  { %v664_v1 = vmov 0.0   ;;  %vm665_vm0 = vmmov 0   ;;  %vm53_vm1 = vcmask 261120   ;;  %s858_s0 = inlined_call_operand.vmem [shape: f32[8,32], index: 0, kind: input, shape index: {}]   ;;  %s859_s1 = inlined_call_operand.vmem [shape: bf16[32,128], index: 1, kind: input, shape index: {}]   ;;  %s860_s2 = inlined_call_operand.vmem [shape: f32[1,128], index: 2, kind: input, shape index: {}]   ;;  %s861_s3 = inlined_call_operand.vmem [shape: bf16[128,128], index: 3, kind: input, shape index: {}]   ;;  %s862_s4 = inlined_call_operand.vmem [shape: f32[1,128], index: 4, kind: input, shape index: {}]   ;;  %s863_s5 = inlined_call_operand.vmem [shape: bf16[128,350], index: 5, kind: input, shape index: {}]   ;;  %s864_s6 = inlined_call_operand.vmem [shape: f32[1,350], index: 6, kind: input, shape index: {}]   ;;  %s865_s7 = inlined_call_operand.hbm [shape: f32[8,350], index: 7, kind: output, shape index: {}]  }
   0x1   :  { %v598_v0 = vld [vmem:[%s859_s1] sm:$0xff]   ;;  %546 = vmatprep.subr.bf16.mxu0 %v664_v1  ;;  %v599_v2 = vld [vmem:[%s859_s1 + $0x8] sm:$0xff]   ;;  %554 = vmatprep.subr.bf16.mxu1 %v664_v1  ;;  %v602_v7 = vld [vmem:[%s861_s3 + $0x10] sm:$0xff]  }
   0x2   :  { %547 = vmatpush3.bf16.msra.mxu0 %v598_v0  ;;  %550 = vmatprep.mubr.msk.bf16.mxu0 %vm665_vm0, %v664_v1  ;;  %v28_v3 = vld [vmem:[%s858_s0] sm:$0xff]  ;;  %v601_v6 = vld [vmem:[%s861_s3 + $0x8] sm:$0xff]   ;;  %v603_v8 = vld [vmem:[%s861_s3 + $0x18] sm:$0xff]  }
   0x3   :  { %548 = vmatprep.subr.bf16.mxu0 %v664_v1  ;;  %v600_v4 = vld [vmem:[%s861_s3] sm:$0xff]   ;;  %570 = vmatprep.mubr.msk.bf16.mxu1 %vm665_vm0, %v664_v1  ;;  %v34_v5 = vpack.c.bf16 %v28_v3, %v28_v3 }
   0x4   :  { %555 = vmatpush3.bf16.msra.mxu1 %v600_v4  ;;  %v604_v9 = vld [vmem:[%s861_s3 + $0x20] sm:$0xff]  }
   0x5   :  { %556 = vmatprep.subr.bf16.mxu1 %v664_v1 }
   0x6   :  { %549 = vmatpush3.bf16.msra.mxu0 %v599_v2 }
   0x8   :  { %557 = vmatpush3.bf16.msra.mxu1 %v601_v6 }
   0x9   :  { %551 = vmatmul.mubr.msk.bf16.vlgmr.msra.gmra.mrb[0].mxu0 %vm53_vm1, %v34_v5  ;;  %558 = vmatprep.subr.bf16.mxu1 %v664_v1 }
   0xc   :  { %559 = vmatpush3.bf16.msra.mxu1 %v602_v7 }
   0xd   :  { %560 = vmatprep.subr.bf16.mxu1 %v664_v1 }
  0x10   :  { %561 = vmatpush3.bf16.msra.mxu1 %v603_v8 }
  0x11   :  { %562 = vmatprep.subr.bf16.mxu1 %v664_v1 }
  0x12   :  { %12 = vsyncpa [#allocation3], 0  ;;  %v605_v10 = vld [vmem:[%s861_s3 + $0x28] sm:$0xff]   ;;  %v606_v11 = vld [vmem:[%s861_s3 + $0x30] sm:$0xff]   ;;  %v666_v45 = vmov 0   ;;  %v246_v54 = vlaneseq  ;;  %vm472_vm2 = vcmask 769024  }
  0x13   :  { %v607_v12 = vld [vmem:[%s861_s3 + $0x38] sm:$0xff]   ;;  %v608_v13 = vld [vmem:[%s863_s5] ss:$12 sps:$4 sm:$0xff]   ;;  %v610_v14 = vld [vmem:[%s863_s5 + $0x4] ss:$12 sps:$4 sm:$0xff]   ;;  %421 = vmatprep.mubr.bf16.mxu0 %v666_v45 }
  0x14   :  { %563 = vmatpush3.bf16.msra.mxu1 %v604_v9  ;;  %v614_v15 = vld [vmem:[%s863_s5 + $0x1c] ss:$12 sps:$4 sm:$0xff]   ;;  %389 = vmatprep.subr.bf16.mxu0 %v610_v14  ;;  %v612_v16 = vld [vmem:[%s863_s5 + $0x18] ss:$12 sps:$4 sm:$0xff]   ;;  %v618_v17 = vld [vmem:[%s863_s5 + $0x34] ss:$12 sps:$4 sm:$0xff]  }
  0x15   :  { %564 = vmatprep.subr.bf16.mxu1 %v664_v1  ;;  %390 = vmatpush1.bf16.msra.mxu0 %v608_v13  ;;  %v616_v18 = vld [vmem:[%s863_s5 + $0x30] ss:$12 sps:$4 sm:$0xff]   ;;  %v622_v19 = vld [vmem:[%s863_s5 + $0x4c] ss:$12 sps:$4 sm:$0xff]   ;;  %v620_v20 = vld [vmem:[%s863_s5 + $0x48] ss:$12 sps:$4 sm:$0xff]  }
  0x16   :  { %391 = vmatprep.subr.bf16.mxu0 %v614_v15  ;;  %v626_v21 = vld [vmem:[%s863_s5 + $0x64] ss:$12 sps:$4 sm:$0xff]   ;;  %v624_v22 = vld [vmem:[%s863_s5 + $0x60] ss:$12 sps:$4 sm:$0xff]   ;;  %v630_v23 = vld [vmem:[%s863_s5 + $0x7c] ss:$12 sps:$4 sm:$0xff]  }
  0x17   :  { %v628_v24 = vld [vmem:[%s863_s5 + $0x78] ss:$12 sps:$4 sm:$0xff]   ;;  %v634_v25 = vld [vmem:[%s863_s5 + $0x94] ss:$12 sps:$4 sm:$0xff]   ;;  %v632_v26 = vld [vmem:[%s863_s5 + $0x90] ss:$12 sps:$4 sm:$0xff]  }
  0x18   :  { %565 = vmatpush3.bf16.msra.mxu1 %v605_v10  ;;  %v488_v27 = vld [vmem:[%s860_s2] ss:$0 sm:$0xff]  ;;  %v611_v34 = vld [vmem:[%s863_s5 + $0x8] ss:$12 sps:$4 sm:$0xff]   ;;  %v619_v37 = vld [vmem:[%s863_s5 + $0x38] ss:$12 sps:$4 sm:$0xff]  }
  0x19   :  { %566 = vmatprep.subr.bf16.mxu1 %v664_v1  ;;  %392 = vmatpush1.bf16.msra.mxu0 %v612_v16  ;;  %v615_v36 = vld [vmem:[%s863_s5 + $0x20] ss:$12 sps:$4 sm:$0xff]   ;;  %v623_v38 = vld [vmem:[%s863_s5 + $0x50] ss:$12 sps:$4 sm:$0xff]   ;;  %v627_v39 = vld [vmem:[%s863_s5 + $0x68] ss:$12 sps:$4 sm:$0xff]  }
  0x1a   :  { %393 = vmatprep.subr.bf16.mxu0 %v618_v17  ;;  %v631_v40 = vld [vmem:[%s863_s5 + $0x80] ss:$12 sps:$4 sm:$0xff]   ;;  %v635_v41 = vld [vmem:[%s863_s5 + $0x98] ss:$12 sps:$4 sm:$0xff]   ;;  %v636_v43 = vld [vmem:[%s863_s5 + $0xa8] ss:$12 sps:$4 sm:$0xff]  }
  0x1b   :  { %v638_v42 = vld [vmem:[%s863_s5 + $0xac] ss:$12 sps:$4 sm:$0xff]   ;;  %v639_v44 = vld [vmem:[%s863_s5 + $0xb0] ss:$12 sps:$4 sm:$0xff]   ;;  %v492_v46 = vld [vmem:[%s862_s4] ss:$0 sm:$0xff] }
  0x1c   :  { %567 = vmatpush3.bf16.msra.mxu1 %v606_v11  ;;  %v247_v55 = vshrl.u32 %v246_v54, 7  ;;  %v243_v58 = vld [vmem:[%s864_s6] sm:$0x7]  ;;  %s667_s4 = smov [#allocation2]  }
  0x1d   :  { %568 = vmatprep.subr.bf16.mxu1 %v664_v1  ;;  %394 = vmatpush1.bf16.msra.mxu0 %v616_v18  ;;  %s480_s21 = sshll.u32 %s667_s4, 4  ;;  %s481_s21 = int_to_ptr.vmem [resolvable:$true] %s480_s21 }
  0x1e   :  { %395 = vmatprep.subr.bf16.mxu0 %v622_v19  ;;  %v248_v56 = vsub.s32 0, %v247_v55  ;;  %v256_v57 = vsub.s32 2, %v247_v55  ;;  %v252_v59 = vsub.s32 1, %v247_v55  ;;  %s640_s6 = scalar_lea.vmem %s481_s21, 384  ;;  %p645_p1 = scmp.lt.s32.totalorder %s481_s21, %s481_s21 }
  0x1f   :  { %p641_p0 = scmp.ne.s32.totalorder %s481_s21, %s640_s6  ;;  %p646_p2 = scmp.lt.s32.totalorder %s640_s6, %s640_s6 }
  0x20   :  { %569 = vmatpush3.bf16.msra.mxu1 %v607_v12  ;;  %v249_v60 = vrot.slane %v243_v58, %v248_v56  ;;  %v257_v61 = vrot.slane %v243_v58, %v256_v57  ;;  %v253_v62 = vrot.slane %v243_v58, %v252_v59 }
  0x21   :  { %574 = vmatprep.subr.bf16.mxu1 %v664_v1  ;;  %396 = vmatpush1.bf16.msra.mxu0 %v620_v20  ;;  %p647_p3 = por %p646_p2, %p645_p1 }
  0x22   :  { %397 = vmatprep.subr.bf16.mxu0 %v626_v21 }
  0x23   :  { %p648_p4 = pnand %p647_p3, %p641_p0 }
  0x25   :  { %398 = vmatpush1.bf16.msra.mxu0 %v624_v22 }
  0x26   :  { %399 = vmatprep.subr.bf16.mxu0 %v630_v23 }
  0x29   :  { %400 = vmatpush1.bf16.msra.mxu0 %v628_v24 }
  0x2a   :  { %401 = vmatprep.subr.bf16.mxu0 %v634_v25 }
  0x2d   :  { %402 = vmatpush1.bf16.msra.mxu0 %v632_v26 }
  0x2e   :  { %403 = vmatprep.subr.bf16.mxu0 %v638_v42 }
  0x31   :  { %404 = vmatpush1.bf16.msra.mxu0 %v636_v43 }
  0xdc   :  { %v91_v28 = vpop.f32.mrb[0].mxu0 }
  0xdd   :  { %v92_v29 = vadd.f32 %v488_v27, %v91_v28  ;;  %v552_v30 = vpop.f32.mrb[1].mxu0 }
  0xde   :  { %v94_v31 = vpop.f32.mrb[2].mxu0 }
  0xdf   :  { %v97_v32 = vmax.f32 %v92_v29, 0.0  ;;  %v553_v33 = vpop.f32.mrb[3].mxu0 }
  0xe1   :  { %v115_v35 = vpack.c.bf16 %v97_v32, %v97_v32 }
  0xe3   :  { %571 = vmatmul.mubr.bf16.vlgmr.msra.gmra.mrb[0].mxu1 %v115_v35 }
  0xe4   :  { %575 = vmatpush3.bf16.msra.mxu1 %v611_v34  ;;  %590 = vmatprep.mubr.msk.bf16.mxu1 %vm665_vm0, %v664_v1 }
  0xe5   :  { %576 = vmatprep.subr.bf16.mxu1 %v664_v1 }
  0xe8   :  { %577 = vmatpush3.bf16.msra.mxu1 %v615_v36 }
  0xe9   :  { %578 = vmatprep.subr.bf16.mxu1 %v664_v1 }
  0xec   :  { %579 = vmatpush3.bf16.msra.mxu1 %v619_v37 }
  0xed   :  { %580 = vmatprep.subr.bf16.mxu1 %v664_v1 }
  0xf0   :  { %581 = vmatpush3.bf16.msra.mxu1 %v623_v38 }
  0xf1   :  { %582 = vmatprep.subr.bf16.mxu1 %v664_v1 }
  0xf4   :  { %583 = vmatpush3.bf16.msra.mxu1 %v627_v39 }
  0xf5   :  { %584 = vmatprep.subr.bf16.mxu1 %v664_v1 }
  0xf8   :  { %585 = vmatpush3.bf16.msra.mxu1 %v631_v40 }
  0xf9   :  { %586 = vmatprep.subr.bf16.mxu1 %v664_v1 }
  0xfc   :  { %587 = vmatpush3.bf16.msra.mxu1 %v635_v41 }
  0xfd   :  { %588 = vmatprep.subr.bf16.mxu1 %v664_v1 }
 0x100   :  { %589 = vmatpush3.bf16.msra.mxu1 %v639_v44 }
 0x1b6   :  { %v204_v47 = vpop.f32.mrb[0].mxu1 }
 0x1b7   :  { %v205_v48 = vadd.f32 %v492_v46, %v204_v47  ;;  %v572_v49 = vpop.f32.mrb[1].mxu1 }
 0x1b8   :  { %v207_v50 = vpop.f32.mrb[2].mxu1 }
 0x1b9   :  { %v210_v51 = vmax.f32 %v205_v48, 0.0  ;;  %v573_v52 = vpop.f32.mrb[3].mxu1 }
 0x1bb   :  { %v244_v53 = vpack.c.bf16 %v210_v51, %v210_v51 }
 0x1bd   :  { %422 = vmatmul.mubr.bf16.vlgmr.msra.gmra.mrb[4].mxu0 %v244_v53  ;;  %591 = vmatmul.mubr.bf16.vlgmr.msra.gmra.mrb[4].mxu1 %v244_v53 }
 0x290   :  { %v423_v63 = vpop.f32.mrb[4].mxu0  ;;  %v464_v0 = vpop.f32.mrb[4].mxu1 }
 0x291   :  { %v424_v1 = vadd.f32 %v423_v63, %v249_v60  ;;  %v465_v2 = vadd.f32 %v464_v0, %v257_v61  ;;  %v425_v3 = vpop.f32.mrb[5].mxu0  ;;  %v592_v4 = vpop.f32.mrb[5].mxu1 }
 0x292   :  { %v426_v5 = vadd.f32 %v425_v3, %v253_v62  ;;  %v427_v6 = vpop.f32.mrb[6].mxu0  ;;  %v467_v7 = vpop.f32.mrb[6].mxu1 }
 0x293   :  { %470 = vst [vmem:[#allocation2] sm:$0xff] %v424_v1  ;;  %473 = vst.msk [vmem:[#allocation2 + $0x10] sm:$0xff] %vm472_vm2, %v465_v2  ;;  %v428_v8 = vpop.f32.mrb[7].mxu0  ;;  %v593_v9 = vpop.f32.mrb[7].mxu1 }
 0x294   :  { %471 = vst [vmem:[#allocation2 + $0x8] sm:$0xff] %v426_v5 }
 0x295   :  { %651 = shalt.err (!%p648_p4)
}
 0x296   :  { %s652_s24 = scalar_lea.hbm %s865_s7, 384 }
 0x297   :  { %p653_p5 = scmp.ne.s32.totalorder %s865_s7, %s652_s24  ;;  %p656_p6 = scmp.lt.u32.totalorder %s652_s24, %s865_s7 }
 0x299   :  { %p658_p7 = pnand %p656_p6, %p653_p5 }
 0x29b   :  { %661 = shalt.err (!%p658_p7)
}
 0x29c   :  { %483 = dma.vmem_to_hbm [thread:$0]  %s481_s21, 384, %s865_s7, [#allocation3]  }
 0x29d   :  { %662 = dma.done.wait [#allocation3], 384  }
 0x29e   :  { %663 = vsyncadd [#allocation3], 4294966912 }
 0x29f   :  { %487 = vsyncpa [#allocation3], 1 }

</bundles_post_ra>
